<compile_context>
chip_gen: v6e
topology: v6e:2x2x1
jax: 0.10.0
libtpu: 0.0.40
codegen_flags: <defaults>
</compile_context>

<pallas_src>
import jax
import jax.numpy as jnp
from jax.experimental import pallas as pl
from jax.experimental.pallas import tpu as pltpu


def _round_up(a, b):
    return (a + b - 1) // b * b


def _make_kernel(hg, L, Lp):
    """Kernel closure over static sizes: hg channels per reduction step."""

    def cntk_kernel(cp_ref, x_ref, wfc_ref, bfc_ref, out_ref, acc_ref):
        # cp_ref:  (4*H_pad,)        SMEM  packed conv params [w0, w1, w2, b]/chan
        # x_ref:   (1, L)            VMEM  input sequence (constant block)
        # wfc_ref: (hg*Lp, tile_o)   VMEM  fc1 weight block (stream dtype)
        # bfc_ref: (1, tile_o)       VMEM  fc1 bias tile (f32)
        # out_ref: (1, tile_o)       VMEM  output tile (f32)
        # acc_ref: (1, tile_o)       VMEM  f32 accumulator scratch
        k = pl.program_id(1)                       # reduction (channel-group) step

        @pl.when(k == 0)
        def _():
            acc_ref[...] = jnp.zeros_like(acc_ref)

        x = x_ref[...]                                                 # (1, L) f32
        idx = jax.lax.broadcasted_iota(jnp.int32, x.shape, 1)
        # Zero-padded neighbours x[l-1] / x[l+1] via lane rotation (XLU) + masks.
        x_m1 = jnp.where(idx >= 1, pltpu.roll(x, shift=1, axis=1), 0.0)
        x_p1 = jnp.where(idx <= L - 2, pltpu.roll(x, shift=L - 1, axis=1), 0.0)

        # Conv1d(k=3, pad=1) + ReLU for this step's hg channels, assembled
        # in-register in PyTorch's view(-1) order (h-major, l-minor) -- no VMEM
        # activation-scratch round-trip.
        rows = []
        for i in range(hg):                        # static unroll, hg is small
            h = hg * k + i                         # global channel index
            w0 = cp_ref[4 * h + 0]
            w1 = cp_ref[4 * h + 1]
            w2 = cp_ref[4 * h + 2]
            b = cp_ref[4 * h + 3]
            row = jnp.maximum(w0 * x_m1 + w1 * x + w2 * x_p1 + b, 0.0)  # (1, L)
            if Lp != L:                            # static; matches zero wt rows
                row = jnp.pad(row, ((0, 0), (0, Lp - L)))
            rows.append(row)
        act = rows[0] if hg == 1 else jnp.concatenate(rows, axis=1)  # (1, hg*Lp)

        # MXU GEMV with f32 accumulation (streamed operands may be bf16).
        acc_ref[...] += jnp.dot(act.astype(wfc_ref.dtype), wfc_ref[...],
                                preferred_element_type=jnp.float32)

        @pl.when(k == pl.num_programs(1) - 1)
        def _():
            out_ref[...] = acc_ref[...] + bfc_ref[...]

    return cntk_kernel


def pack_cntk_params(w_conv, b_conv, w_fc, b_fc, *,
                     stream_dtype=jnp.bfloat16,
                     tile_budget_bytes=8 * 1024 * 1024):
    """One-time packing of the module parameters for the Pallas kernel.

    Do this once at init (NOT per forward call) so XLA does not re-materialize
    the transposed / padded fc weight in HBM every call.
    """
    H = w_conv.shape[0]
    O, HL = w_fc.shape
    assert HL % H == 0
    L = HL // H
    Lp = _round_up(L, 8)                       # sublane-aligned conv-row length
    itemsize = jnp.dtype(stream_dtype).itemsize

    # ---- output (O) tiling ----
    if O <= 128:
        tile_o = O                             # single full-extent block, no pad
        O_total = O
    else:
        O_pad = _round_up(O, 128)
        max_tile = max(128, (tile_budget_bytes // (Lp * itemsize)) // 128 * 128)
        tile_o = min(O_pad, max_tile)
        if O_pad >= 256:                       # >=2 O-tiles: v7x megacore + pipeline
            tile_o = min(tile_o, _round_up((O_pad + 1) // 2, 128))
        O_total = _round_up(O_pad, tile_o)

    # ---- channel-group (reduction) tiling over H ----
    # TODO(synk): also split L itself if a single (Lp, tile_o) weight slab ever
    # exceeds the VMEM budget (only for extremely long sequences).
    hg = max(1, min(H, tile_budget_bytes // (Lp * tile_o * itemsize)))
    n_hg = -(-H // hg)                         # ceil-div
    hg = -(-H // n_hg)                         # rebalance groups evenly
    H_pad = hg * n_hg

    # ---- conv params: one tiny 1D SMEM table [w0, w1, w2, b] per channel ----
    cp = jnp.concatenate([w_conv.reshape(H, 3).astype(jnp.float32),
                          b_conv.reshape(H, 1).astype(jnp.float32)], axis=1)
    cp = jnp.pad(cp, ((0, H_pad - H), (0, 0))).reshape(4 * H_pad)

    # ---- fc1 weight packed once: rows follow x.view(-1)'s h-major / l-minor
    # flatten order; padded channels / lanes / output columns are zero. ----
    wfc = w_fc.astype(jnp.float32).reshape(O, H, L).transpose(1, 2, 0)  # (H, L, O)
    wfc = jnp.pad(wfc, ((0, H_pad - H), (0, Lp - L), (0, O_total - O)))
    wfc = wfc.reshape(H_pad * Lp, O_total).astype(stream_dtype)
    bfc = jnp.pad(b_fc.reshape(1, O).astype(jnp.float32),
                  ((0, 0), (0, O_total - O)))

    meta = dict(H=H, L=L, Lp=Lp, hg=hg, n_hg=n_hg, O=O, O_total=O_total,
                tile_o=tile_o, stream_itemsize=itemsize)
    return cp, wfc, bfc, meta


def cntk_1d_1l_packed(x, cp, wfc, bfc, meta):
    """Forward pass with pre-packed params. x: (1, 1, L) f32. Returns (O,) f32."""
    L, Lp, hg, n_hg = meta["L"], meta["Lp"], meta["hg"], meta["n_hg"]
    O, O_total, tile_o = meta["O"], meta["O_total"], meta["tile_o"]
    n_o = O_total // tile_o

    n, c, Lx = x.shape
    assert n == 1 and c == 1 and Lx == L, "x.view(-1) + fc1 requires batch=1, C_in=1"
    x2 = x.reshape(1, L).astype(jnp.float32)

    wblk_bytes = hg * Lp * tile_o * meta["stream_itemsize"]
    # Double-buffered weight stream + small out/bias/acc/x buffers + headroom;
    # capped at 48 MiB (safe on v5e/v6e 128 MiB and v7x 64 MiB physical VMEM).
    vmem_limit = int(min(48 * 1024 * 1024,
                         max(16 * 1024 * 1024, 2 * wblk_bytes + (8 << 20))))

    kernel = _make_kernel(hg=hg, L=L, Lp=Lp)

    out = pl.pallas_call(
        kernel,
        out_shape=jax.ShapeDtypeStruct((1, O_total), jnp.float32),
        grid_spec=pltpu.PrefetchScalarGridSpec(
            num_scalar_prefetch=0,
            grid=(n_o, n_hg),                                     # reduction last
            in_specs=[
                pl.BlockSpec(memory_space=pltpu.MemorySpace.SMEM),     # conv params
                pl.BlockSpec((1, L), lambda o, k: (0, 0)),             # x (constant)
                pl.BlockSpec((hg * Lp, tile_o), lambda o, k: (k, o)),  # fc wt block
                pl.BlockSpec((1, tile_o), lambda o, k: (0, o)),        # fc bias tile
            ],
            out_specs=pl.BlockSpec((1, tile_o), lambda o, k: (0, o)),
            scratch_shapes=[pltpu.VMEM((1, tile_o), jnp.float32)],     # f32 acc
        ),
        compiler_params=pltpu.CompilerParams(
            dimension_semantics=("parallel", "arbitrary"),
            vmem_limit_bytes=vmem_limit,
        ),
    )(cp, x2, wfc, bfc)
    return out[0, :O]


def cntk_1d_1l(x, w_conv, b_conv, w_fc, b_fc, *, stream_dtype=jnp.bfloat16):
    """Convenience wrapper (packs per call). Prefer pack_cntk_params once + _packed."""
    return cntk_1d_1l_packed(
        x, *pack_cntk_params(w_conv, b_conv, w_fc, b_fc, stream_dtype=stream_dtype))


def _reference(x, w_conv, b_conv, w_fc, b_fc):
    """Pure-JAX f32 reference of the PyTorch forward (for correctness check)."""
    _, _, L = x.shape
    xs = x.reshape(L)
    xp = jnp.pad(xs, (1, 1))
    cols = jnp.stack([xp[0:L], xp[1:L + 1], xp[2:L + 2]], axis=0)     # (3, L)
    conv = w_conv.reshape(-1, 3) @ cols + b_conv[:, None]             # (H, L)
    act = jnp.maximum(conv, 0.0).reshape(-1)                          # (H*L,)
    return w_fc @ act + b_fc                                          # (O,)


if __name__ == "__main__":
    input_dim = 128     # L
    hidden_size1 = 8    # H
    output_size = 1     # O

    key = jax.random.PRNGKey(0)
    k_x, k_wc, k_bc, k_wf, k_bf = jax.random.split(key, 5)

    bound_c = 1.0 / jnp.sqrt(1.0 * 3.0)
    bound_f = 1.0 / jnp.sqrt(float(hidden_size1 * input_dim))
    w_conv = jax.random.uniform(k_wc, (hidden_size1, 1, 3),
                                minval=-bound_c, maxval=bound_c, dtype=jnp.float32)
    b_conv = jax.random.uniform(k_bc, (hidden_size1,),
                                minval=-bound_c, maxval=bound_c, dtype=jnp.float32)
    w_fc = jax.random.uniform(k_wf, (output_size, hidden_size1 * input_dim),
                              minval=-bound_f, maxval=bound_f, dtype=jnp.float32)
    b_fc = jax.random.uniform(k_bf, (output_size,),
                              minval=-bound_f, maxval=bound_f, dtype=jnp.float32)

    x = jax.random.normal(k_x, (1, 1, input_dim), dtype=jnp.float32)

    ref = _reference(x, w_conv, b_conv, w_fc, b_fc)

    # Production path: bf16 weight/act streaming (f32 MXU accumulation), packed ONCE.
    packed_bf16 = pack_cntk_params(w_conv, b_conv, w_fc, b_fc,
                                   stream_dtype=jnp.bfloat16)
    out_bf16 = jax.block_until_ready(cntk_1d_1l_packed(x, *packed_bf16))
    assert out_bf16.shape == (output_size,)
    assert jnp.allclose(out_bf16, ref, atol=5e-2, rtol=5e-2), (out_bf16, ref)

    # Exactness path: f32 streaming matches the f32 reference tightly.
    packed_f32 = pack_cntk_params(w_conv, b_conv, w_fc, b_fc,
                                  stream_dtype=jnp.float32)
    out_f32 = jax.block_until_ready(cntk_1d_1l_packed(x, *packed_f32))
    assert out_f32.shape == (output_size,)
    assert jnp.allclose(out_f32, ref, atol=1e-4, rtol=1e-4), (out_f32, ref)

    print("KERNEL_OK")
</pallas_src>

<mosaic_0001>
module attributes {stable_mosaic.version = 11 : i64} {
  func.func @cntk_kernel(%arg0: i32, %arg1: i32, %arg2: memref<32xf32, #tpu.memory_space<smem>>, %arg3: memref<1x128xf32, #tpu.memory_space<vmem>>, %arg4: memref<1024x1xbf16, #tpu.memory_space<vmem>>, %arg5: memref<1x1xf32, #tpu.memory_space<vmem>>, %arg6: memref<1x1xf32, #tpu.memory_space<vmem>>, %arg7: memref<1x1xf32, #tpu.memory_space<vmem>>) attributes {dimension_semantics = [#tpu.dimension_semantics<parallel>, #tpu.dimension_semantics<arbitrary>], iteration_bounds = array<i64: 1, 1>, scalar_prefetch = 0 : i64, scratch_operands = 1 : i64, tpu.core_type = #tpu.core_type<tc>, window_params = [{transform_indices = @transform_0, window_bounds = array<i64: 32>}, {pipeline_mode = #tpu.pipeline_mode<synchronous>, transform_indices = @transform_1, window_bounds = array<i64: 1, 128>}, {transform_indices = @transform_2, window_bounds = array<i64: 1024, 1>}, {transform_indices = @transform_3, window_bounds = array<i64: 1, 1>}, {transform_indices = @transform_4, window_bounds = array<i64: 1, 1>}]} {
    %c0_i32 = arith.constant 0 : i32
    %0 = arith.cmpi eq, %arg1, %c0_i32 : i32
    %1 = arith.extui %0 : i1 to i32
    %c0_i32_0 = arith.constant 0 : i32
    %2 = arith.cmpi ne, %1, %c0_i32_0 : i32
    scf.if %2 {
      %cst_94 = arith.constant 0.000000e+00 : f32
      %265 = vector.broadcast %cst_94 : f32 to vector<1x1xf32>
      %c0_95 = arith.constant 0 : index
      %c0_96 = arith.constant 0 : index
      %266 = vector.load %arg7[%c0_95, %c0_96] : memref<1x1xf32, #tpu.memory_space<vmem>>, vector<1x1xf32>
      tpu.vector_store %arg7[%c0_95, %c0_96], %265 {strides = array<i32>} : memref<1x1xf32, #tpu.memory_space<vmem>>, vector<1x1xf32>,
    } else {
    }
    %c0 = arith.constant 0 : index
    %c0_1 = arith.constant 0 : index
    %3 = vector.load %arg3[%c0, %c0_1] : memref<1x128xf32, #tpu.memory_space<vmem>>, vector<1x128xf32>
    %4 = tpu.iota {dimensions = array<i32: 1>} : vector<1x128xi32>
    %c1_i32 = arith.constant 1 : i32
    %5 = vector.broadcast %c1_i32 : i32 to vector<1x128xi32>
    %6 = arith.cmpi sge, %4, %5 : vector<1x128xi32>
    %c1_i32_2 = arith.constant 1 : i32
    %7 = tpu.dynamic_rotate %3 by %c1_i32_2 dim 1 : vector<1x128xf32>, i32 -> vector<1x128xf32>
    %cst = arith.constant 0.000000e+00 : f32
    %8 = vector.broadcast %cst : f32 to vector<1x128xf32>
    %9 = arith.select %6, %7, %8 : vector<1x128xi1>, vector<1x128xf32>
    %c126_i32 = arith.constant 126 : i32
    %10 = vector.broadcast %c126_i32 : i32 to vector<1x128xi32>
    %11 = arith.cmpi sle, %4, %10 : vector<1x128xi32>
    %c127_i32 = arith.constant 127 : i32
    %12 = tpu.dynamic_rotate %3 by %c127_i32 dim 1 : vector<1x128xf32>, i32 -> vector<1x128xf32>
    %cst_3 = arith.constant 0.000000e+00 : f32
    %13 = vector.broadcast %cst_3 : f32 to vector<1x128xf32>
    %14 = arith.select %11, %12, %13 : vector<1x128xi1>, vector<1x128xf32>
    %c8_i32 = arith.constant 8 : i32
    %15 = arith.muli %c8_i32, %arg1 : i32
    %c0_i32_4 = arith.constant 0 : i32
    %16 = arith.addi %15, %c0_i32_4 : i32
    %c4_i32 = arith.constant 4 : i32
    %17 = arith.muli %c4_i32, %16 : i32
    %c0_i32_5 = arith.constant 0 : i32
    %18 = arith.addi %17, %c0_i32_5 : i32
    %19 = arith.index_cast %18 : i32 to index
    %20 = memref.load %arg2[%19] : memref<32xf32, #tpu.memory_space<smem>>
    %c4_i32_6 = arith.constant 4 : i32
    %21 = arith.muli %c4_i32_6, %16 : i32
    %c1_i32_7 = arith.constant 1 : i32
    %22 = arith.addi %21, %c1_i32_7 : i32
    %23 = arith.index_cast %22 : i32 to index
    %24 = memref.load %arg2[%23] : memref<32xf32, #tpu.memory_space<smem>>
    %c4_i32_8 = arith.constant 4 : i32
    %25 = arith.muli %c4_i32_8, %16 : i32
    %c2_i32 = arith.constant 2 : i32
    %26 = arith.addi %25, %c2_i32 : i32
    %27 = arith.index_cast %26 : i32 to index
    %28 = memref.load %arg2[%27] : memref<32xf32, #tpu.memory_space<smem>>
    %c4_i32_9 = arith.constant 4 : i32
    %29 = arith.muli %c4_i32_9, %16 : i32
    %c3_i32 = arith.constant 3 : i32
    %30 = arith.addi %29, %c3_i32 : i32
    %31 = arith.index_cast %30 : i32 to index
    %32 = memref.load %arg2[%31] : memref<32xf32, #tpu.memory_space<smem>>
    %33 = vector.broadcast %20 : f32 to vector<1x128xf32>
    %34 = arith.mulf %33, %9 : vector<1x128xf32>
    %35 = vector.broadcast %24 : f32 to vector<1x128xf32>
    %36 = arith.mulf %35, %3 : vector<1x128xf32>
    %37 = arith.addf %34, %36 : vector<1x128xf32>
    %38 = vector.broadcast %28 : f32 to vector<1x128xf32>
    %39 = arith.mulf %38, %14 : vector<1x128xf32>
    %40 = arith.addf %37, %39 : vector<1x128xf32>
    %41 = vector.broadcast %32 : f32 to vector<1x128xf32>
    %42 = arith.addf %40, %41 : vector<1x128xf32>
    %cst_10 = arith.constant 0.000000e+00 : f32
    %43 = vector.broadcast %cst_10 : f32 to vector<1x128xf32>
    %44 = arith.maximumf %42, %43 : vector<1x128xf32>
    %c8_i32_11 = arith.constant 8 : i32
    %45 = arith.muli %c8_i32_11, %arg1 : i32
    %c1_i32_12 = arith.constant 1 : i32
    %46 = arith.addi %45, %c1_i32_12 : i32
    %c4_i32_13 = arith.constant 4 : i32
    %47 = arith.muli %c4_i32_13, %46 : i32
    %c0_i32_14 = arith.constant 0 : i32
    %48 = arith.addi %47, %c0_i32_14 : i32
    %49 = arith.index_cast %48 : i32 to index
    %50 = memref.load %arg2[%49] : memref<32xf32, #tpu.memory_space<smem>>
    %c4_i32_15 = arith.constant 4 : i32
    %51 = arith.muli %c4_i32_15, %46 : i32
    %c1_i32_16 = arith.constant 1 : i32
    %52 = arith.addi %51, %c1_i32_16 : i32
    %53 = arith.index_cast %52 : i32 to index
    %54 = memref.load %arg2[%53] : memref<32xf32, #tpu.memory_space<smem>>
    %c4_i32_17 = arith.constant 4 : i32
    %55 = arith.muli %c4_i32_17, %46 : i32
    %c2_i32_18 = arith.constant 2 : i32
    %56 = arith.addi %55, %c2_i32_18 : i32
    %57 = arith.index_cast %56 : i32 to index
    %58 = memref.load %arg2[%57] : memref<32xf32, #tpu.memory_space<smem>>
    %c4_i32_19 = arith.constant 4 : i32
    %59 = arith.muli %c4_i32_19, %46 : i32
    %c3_i32_20 = arith.constant 3 : i32
    %60 = arith.addi %59, %c3_i32_20 : i32
    %61 = arith.index_cast %60 : i32 to index
    %62 = memref.load %arg2[%61] : memref<32xf32, #tpu.memory_space<smem>>
    %63 = vector.broadcast %50 : f32 to vector<1x128xf32>
    %64 = arith.mulf %63, %9 : vector<1x128xf32>
    %65 = vector.broadcast %54 : f32 to vector<1x128xf32>
    %66 = arith.mulf %65, %3 : vector<1x128xf32>
    %67 = arith.addf %64, %66 : vector<1x128xf32>
    %68 = vector.broadcast %58 : f32 to vector<1x128xf32>
    %69 = arith.mulf %68, %14 : vector<1x128xf32>
    %70 = arith.addf %67, %69 : vector<1x128xf32>
    %71 = vector.broadcast %62 : f32 to vector<1x128xf32>
    %72 = arith.addf %70, %71 : vector<1x128xf32>
    %cst_21 = arith.constant 0.000000e+00 : f32
    %73 = vector.broadcast %cst_21 : f32 to vector<1x128xf32>
    %74 = arith.maximumf %72, %73 : vector<1x128xf32>
    %c8_i32_22 = arith.constant 8 : i32
    %75 = arith.muli %c8_i32_22, %arg1 : i32
    %c2_i32_23 = arith.constant 2 : i32
    %76 = arith.addi %75, %c2_i32_23 : i32
    %c4_i32_24 = arith.constant 4 : i32
    %77 = arith.muli %c4_i32_24, %76 : i32
    %c0_i32_25 = arith.constant 0 : i32
    %78 = arith.addi %77, %c0_i32_25 : i32
    %79 = arith.index_cast %78 : i32 to index
    %80 = memref.load %arg2[%79] : memref<32xf32, #tpu.memory_space<smem>>
    %c4_i32_26 = arith.constant 4 : i32
    %81 = arith.muli %c4_i32_26, %76 : i32
    %c1_i32_27 = arith.constant 1 : i32
    %82 = arith.addi %81, %c1_i32_27 : i32
    %83 = arith.index_cast %82 : i32 to index
    %84 = memref.load %arg2[%83] : memref<32xf32, #tpu.memory_space<smem>>
    %c4_i32_28 = arith.constant 4 : i32
    %85 = arith.muli %c4_i32_28, %76 : i32
    %c2_i32_29 = arith.constant 2 : i32
    %86 = arith.addi %85, %c2_i32_29 : i32
    %87 = arith.index_cast %86 : i32 to index
    %88 = memref.load %arg2[%87] : memref<32xf32, #tpu.memory_space<smem>>
    %c4_i32_30 = arith.constant 4 : i32
    %89 = arith.muli %c4_i32_30, %76 : i32
    %c3_i32_31 = arith.constant 3 : i32
    %90 = arith.addi %89, %c3_i32_31 : i32
    %91 = arith.index_cast %90 : i32 to index
    %92 = memref.load %arg2[%91] : memref<32xf32, #tpu.memory_space<smem>>
    %93 = vector.broadcast %80 : f32 to vector<1x128xf32>
    %94 = arith.mulf %93, %9 : vector<1x128xf32>
    %95 = vector.broadcast %84 : f32 to vector<1x128xf32>
    %96 = arith.mulf %95, %3 : vector<1x128xf32>
    %97 = arith.addf %94, %96 : vector<1x128xf32>
    %98 = vector.broadcast %88 : f32 to vector<1x128xf32>
    %99 = arith.mulf %98, %14 : vector<1x128xf32>
    %100 = arith.addf %97, %99 : vector<1x128xf32>
    %101 = vector.broadcast %92 : f32 to vector<1x128xf32>
    %102 = arith.addf %100, %101 : vector<1x128xf32>
    %cst_32 = arith.constant 0.000000e+00 : f32
    %103 = vector.broadcast %cst_32 : f32 to vector<1x128xf32>
    %104 = arith.maximumf %102, %103 : vector<1x128xf32>
    %c8_i32_33 = arith.constant 8 : i32
    %105 = arith.muli %c8_i32_33, %arg1 : i32
    %c3_i32_34 = arith.constant 3 : i32
    %106 = arith.addi %105, %c3_i32_34 : i32
    %c4_i32_35 = arith.constant 4 : i32
    %107 = arith.muli %c4_i32_35, %106 : i32
    %c0_i32_36 = arith.constant 0 : i32
    %108 = arith.addi %107, %c0_i32_36 : i32
    %109 = arith.index_cast %108 : i32 to index
    %110 = memref.load %arg2[%109] : memref<32xf32, #tpu.memory_space<smem>>
    %c4_i32_37 = arith.constant 4 : i32
    %111 = arith.muli %c4_i32_37, %106 : i32
    %c1_i32_38 = arith.constant 1 : i32
    %112 = arith.addi %111, %c1_i32_38 : i32
    %113 = arith.index_cast %112 : i32 to index
    %114 = memref.load %arg2[%113] : memref<32xf32, #tpu.memory_space<smem>>
    %c4_i32_39 = arith.constant 4 : i32
    %115 = arith.muli %c4_i32_39, %106 : i32
    %c2_i32_40 = arith.constant 2 : i32
    %116 = arith.addi %115, %c2_i32_40 : i32
    %117 = arith.index_cast %116 : i32 to index
    %118 = memref.load %arg2[%117] : memref<32xf32, #tpu.memory_space<smem>>
    %c4_i32_41 = arith.constant 4 : i32
    %119 = arith.muli %c4_i32_41, %106 : i32
    %c3_i32_42 = arith.constant 3 : i32
    %120 = arith.addi %119, %c3_i32_42 : i32
    %121 = arith.index_cast %120 : i32 to index
    %122 = memref.load %arg2[%121] : memref<32xf32, #tpu.memory_space<smem>>
    %123 = vector.broadcast %110 : f32 to vector<1x128xf32>
    %124 = arith.mulf %123, %9 : vector<1x128xf32>
    %125 = vector.broadcast %114 : f32 to vector<1x128xf32>
    %126 = arith.mulf %125, %3 : vector<1x128xf32>
    %127 = arith.addf %124, %126 : vector<1x128xf32>
    %128 = vector.broadcast %118 : f32 to vector<1x128xf32>
    %129 = arith.mulf %128, %14 : vector<1x128xf32>
    %130 = arith.addf %127, %129 : vector<1x128xf32>
    %131 = vector.broadcast %122 : f32 to vector<1x128xf32>
    %132 = arith.addf %130, %131 : vector<1x128xf32>
    %cst_43 = arith.constant 0.000000e+00 : f32
    %133 = vector.broadcast %cst_43 : f32 to vector<1x128xf32>
    %134 = arith.maximumf %132, %133 : vector<1x128xf32>
    %c8_i32_44 = arith.constant 8 : i32
    %135 = arith.muli %c8_i32_44, %arg1 : i32
    %c4_i32_45 = arith.constant 4 : i32
    %136 = arith.addi %135, %c4_i32_45 : i32
    %c4_i32_46 = arith.constant 4 : i32
    %137 = arith.muli %c4_i32_46, %136 : i32
    %c0_i32_47 = arith.constant 0 : i32
    %138 = arith.addi %137, %c0_i32_47 : i32
    %139 = arith.index_cast %138 : i32 to index
    %140 = memref.load %arg2[%139] : memref<32xf32, #tpu.memory_space<smem>>
    %c4_i32_48 = arith.constant 4 : i32
    %141 = arith.muli %c4_i32_48, %136 : i32
    %c1_i32_49 = arith.constant 1 : i32
    %142 = arith.addi %141, %c1_i32_49 : i32
    %143 = arith.index_cast %142 : i32 to index
    %144 = memref.load %arg2[%143] : memref<32xf32, #tpu.memory_space<smem>>
    %c4_i32_50 = arith.constant 4 : i32
    %145 = arith.muli %c4_i32_50, %136 : i32
    %c2_i32_51 = arith.constant 2 : i32
    %146 = arith.addi %145, %c2_i32_51 : i32
    %147 = arith.index_cast %146 : i32 to index
    %148 = memref.load %arg2[%147] : memref<32xf32, #tpu.memory_space<smem>>
    %c4_i32_52 = arith.constant 4 : i32
    %149 = arith.muli %c4_i32_52, %136 : i32
    %c3_i32_53 = arith.constant 3 : i32
    %150 = arith.addi %149, %c3_i32_53 : i32
    %151 = arith.index_cast %150 : i32 to index
    %152 = memref.load %arg2[%151] : memref<32xf32, #tpu.memory_space<smem>>
    %153 = vector.broadcast %140 : f32 to vector<1x128xf32>
    %154 = arith.mulf %153, %9 : vector<1x128xf32>
    %155 = vector.broadcast %144 : f32 to vector<1x128xf32>
    %156 = arith.mulf %155, %3 : vector<1x128xf32>
    %157 = arith.addf %154, %156 : vector<1x128xf32>
    %158 = vector.broadcast %148 : f32 to vector<1x128xf32>
    %159 = arith.mulf %158, %14 : vector<1x128xf32>
    %160 = arith.addf %157, %159 : vector<1x128xf32>
    %161 = vector.broadcast %152 : f32 to vector<1x128xf32>
    %162 = arith.addf %160, %161 : vector<1x128xf32>
    %cst_54 = arith.constant 0.000000e+00 : f32
    %163 = vector.broadcast %cst_54 : f32 to vector<1x128xf32>
    %164 = arith.maximumf %162, %163 : vector<1x128xf32>
    %c8_i32_55 = arith.constant 8 : i32
    %165 = arith.muli %c8_i32_55, %arg1 : i32
    %c5_i32 = arith.constant 5 : i32
    %166 = arith.addi %165, %c5_i32 : i32
    %c4_i32_56 = arith.constant 4 : i32
    %167 = arith.muli %c4_i32_56, %166 : i32
    %c0_i32_57 = arith.constant 0 : i32
    %168 = arith.addi %167, %c0_i32_57 : i32
    %169 = arith.index_cast %168 : i32 to index
    %170 = memref.load %arg2[%169] : memref<32xf32, #tpu.memory_space<smem>>
    %c4_i32_58 = arith.constant 4 : i32
    %171 = arith.muli %c4_i32_58, %166 : i32
    %c1_i32_59 = arith.constant 1 : i32
    %172 = arith.addi %171, %c1_i32_59 : i32
    %173 = arith.index_cast %172 : i32 to index
    %174 = memref.load %arg2[%173] : memref<32xf32, #tpu.memory_space<smem>>
    %c4_i32_60 = arith.constant 4 : i32
    %175 = arith.muli %c4_i32_60, %166 : i32
    %c2_i32_61 = arith.constant 2 : i32
    %176 = arith.addi %175, %c2_i32_61 : i32
    %177 = arith.index_cast %176 : i32 to index
    %178 = memref.load %arg2[%177] : memref<32xf32, #tpu.memory_space<smem>>
    %c4_i32_62 = arith.constant 4 : i32
    %179 = arith.muli %c4_i32_62, %166 : i32
    %c3_i32_63 = arith.constant 3 : i32
    %180 = arith.addi %179, %c3_i32_63 : i32
    %181 = arith.index_cast %180 : i32 to index
    %182 = memref.load %arg2[%181] : memref<32xf32, #tpu.memory_space<smem>>
    %183 = vector.broadcast %170 : f32 to vector<1x128xf32>
    %184 = arith.mulf %183, %9 : vector<1x128xf32>
    %185 = vector.broadcast %174 : f32 to vector<1x128xf32>
    %186 = arith.mulf %185, %3 : vector<1x128xf32>
    %187 = arith.addf %184, %186 : vector<1x128xf32>
    %188 = vector.broadcast %178 : f32 to vector<1x128xf32>
    %189 = arith.mulf %188, %14 : vector<1x128xf32>
    %190 = arith.addf %187, %189 : vector<1x128xf32>
    %191 = vector.broadcast %182 : f32 to vector<1x128xf32>
    %192 = arith.addf %190, %191 : vector<1x128xf32>
    %cst_64 = arith.constant 0.000000e+00 : f32
    %193 = vector.broadcast %cst_64 : f32 to vector<1x128xf32>
    %194 = arith.maximumf %192, %193 : vector<1x128xf32>
    %c8_i32_65 = arith.constant 8 : i32
    %195 = arith.muli %c8_i32_65, %arg1 : i32
    %c6_i32 = arith.constant 6 : i32
    %196 = arith.addi %195, %c6_i32 : i32
    %c4_i32_66 = arith.constant 4 : i32
    %197 = arith.muli %c4_i32_66, %196 : i32
    %c0_i32_67 = arith.constant 0 : i32
    %198 = arith.addi %197, %c0_i32_67 : i32
    %199 = arith.index_cast %198 : i32 to index
    %200 = memref.load %arg2[%199] : memref<32xf32, #tpu.memory_space<smem>>
    %c4_i32_68 = arith.constant 4 : i32
    %201 = arith.muli %c4_i32_68, %196 : i32
    %c1_i32_69 = arith.constant 1 : i32
    %202 = arith.addi %201, %c1_i32_69 : i32
    %203 = arith.index_cast %202 : i32 to index
    %204 = memref.load %arg2[%203] : memref<32xf32, #tpu.memory_space<smem>>
    %c4_i32_70 = arith.constant 4 : i32
    %205 = arith.muli %c4_i32_70, %196 : i32
    %c2_i32_71 = arith.constant 2 : i32
    %206 = arith.addi %205, %c2_i32_71 : i32
    %207 = arith.index_cast %206 : i32 to index
    %208 = memref.load %arg2[%207] : memref<32xf32, #tpu.memory_space<smem>>
    %c4_i32_72 = arith.constant 4 : i32
    %209 = arith.muli %c4_i32_72, %196 : i32
    %c3_i32_73 = arith.constant 3 : i32
    %210 = arith.addi %209, %c3_i32_73 : i32
    %211 = arith.index_cast %210 : i32 to index
    %212 = memref.load %arg2[%211] : memref<32xf32, #tpu.memory_space<smem>>
    %213 = vector.broadcast %200 : f32 to vector<1x128xf32>
    %214 = arith.mulf %213, %9 : vector<1x128xf32>
    %215 = vector.broadcast %204 : f32 to vector<1x128xf32>
    %216 = arith.mulf %215, %3 : vector<1x128xf32>
    %217 = arith.addf %214, %216 : vector<1x128xf32>
    %218 = vector.broadcast %208 : f32 to vector<1x128xf32>
    %219 = arith.mulf %218, %14 : vector<1x128xf32>
    %220 = arith.addf %217, %219 : vector<1x128xf32>
    %221 = vector.broadcast %212 : f32 to vector<1x128xf32>
    %222 = arith.addf %220, %221 : vector<1x128xf32>
    %cst_74 = arith.constant 0.000000e+00 : f32
    %223 = vector.broadcast %cst_74 : f32 to vector<1x128xf32>
    %224 = arith.maximumf %222, %223 : vector<1x128xf32>
    %c8_i32_75 = arith.constant 8 : i32
    %225 = arith.muli %c8_i32_75, %arg1 : i32
    %c7_i32 = arith.constant 7 : i32
    %226 = arith.addi %225, %c7_i32 : i32
    %c4_i32_76 = arith.constant 4 : i32
    %227 = arith.muli %c4_i32_76, %226 : i32
    %c0_i32_77 = arith.constant 0 : i32
    %228 = arith.addi %227, %c0_i32_77 : i32
    %229 = arith.index_cast %228 : i32 to index
    %230 = memref.load %arg2[%229] : memref<32xf32, #tpu.memory_space<smem>>
    %c4_i32_78 = arith.constant 4 : i32
    %231 = arith.muli %c4_i32_78, %226 : i32
    %c1_i32_79 = arith.constant 1 : i32
    %232 = arith.addi %231, %c1_i32_79 : i32
    %233 = arith.index_cast %232 : i32 to index
    %234 = memref.load %arg2[%233] : memref<32xf32, #tpu.memory_space<smem>>
    %c4_i32_80 = arith.constant 4 : i32
    %235 = arith.muli %c4_i32_80, %226 : i32
    %c2_i32_81 = arith.constant 2 : i32
    %236 = arith.addi %235, %c2_i32_81 : i32
    %237 = arith.index_cast %236 : i32 to index
    %238 = memref.load %arg2[%237] : memref<32xf32, #tpu.memory_space<smem>>
    %c4_i32_82 = arith.constant 4 : i32
    %239 = arith.muli %c4_i32_82, %226 : i32
    %c3_i32_83 = arith.constant 3 : i32
    %240 = arith.addi %239, %c3_i32_83 : i32
    %241 = arith.index_cast %240 : i32 to index
    %242 = memref.load %arg2[%241] : memref<32xf32, #tpu.memory_space<smem>>
    %243 = vector.broadcast %230 : f32 to vector<1x128xf32>
    %244 = arith.mulf %243, %9 : vector<1x128xf32>
    %245 = vector.broadcast %234 : f32 to vector<1x128xf32>
    %246 = arith.mulf %245, %3 : vector<1x128xf32>
    %247 = arith.addf %244, %246 : vector<1x128xf32>
    %248 = vector.broadcast %238 : f32 to vector<1x128xf32>
    %249 = arith.mulf %248, %14 : vector<1x128xf32>
    %250 = arith.addf %247, %249 : vector<1x128xf32>
    %251 = vector.broadcast %242 : f32 to vector<1x128xf32>
    %252 = arith.addf %250, %251 : vector<1x128xf32>
    %cst_84 = arith.constant 0.000000e+00 : f32
    %253 = vector.broadcast %cst_84 : f32 to vector<1x128xf32>
    %254 = arith.maximumf %252, %253 : vector<1x128xf32>
    %255 = tpu.concatenate %44, %74, %104, %134, %164, %194, %224, %254 in 1 : vector<1x128xf32>, vector<1x128xf32>, vector<1x128xf32>, vector<1x128xf32>, vector<1x128xf32>, vector<1x128xf32>, vector<1x128xf32>, vector<1x128xf32> -> vector<1x1024xf32>
    %c0_85 = arith.constant 0 : index
    %c0_86 = arith.constant 0 : index
    %256 = vector.load %arg7[%c0_85, %c0_86] : memref<1x1xf32, #tpu.memory_space<vmem>>, vector<1x1xf32>
    %257 = arith.truncf %255 : vector<1x1024xf32> to vector<1x1024xbf16>
    %c0_87 = arith.constant 0 : index
    %c0_88 = arith.constant 0 : index
    %258 = vector.load %arg4[%c0_87, %c0_88] : memref<1024x1xbf16, #tpu.memory_space<vmem>>, vector<1024x1xbf16>
    %cst_89 = arith.constant dense<0.000000e+00> : vector<1x1xf32>
    %259 = tpu.matmul %257, %258, %cst_89 {dimension_numbers = #tpu.dot_dimension_numbers<[1], [0], [0], [1], [0, 0, 1, 1], [], []>} : vector<1x1024xbf16>, vector<1024x1xbf16>, vector<1x1xf32> -> vector<1x1xf32>
    %260 = arith.addf %256, %259 : vector<1x1xf32>
    %c0_90 = arith.constant 0 : index
    %c0_91 = arith.constant 0 : index
    %261 = vector.load %arg7[%c0_90, %c0_91] : memref<1x1xf32, #tpu.memory_space<vmem>>, vector<1x1xf32>
    tpu.vector_store %arg7[%c0_90, %c0_91], %260 {strides = array<i32>} : memref<1x1xf32, #tpu.memory_space<vmem>>, vector<1x1xf32>,
    %c0_i32_92 = arith.constant 0 : i32
    %262 = arith.cmpi eq, %arg1, %c0_i32_92 : i32
    %263 = arith.extui %262 : i1 to i32
    %c0_i32_93 = arith.constant 0 : i32
    %264 = arith.cmpi ne, %263, %c0_i32_93 : i32
    scf.if %264 {
      %c0_94 = arith.constant 0 : index
      %c0_95 = arith.constant 0 : index
      %265 = vector.load %arg7[%c0_94, %c0_95] : memref<1x1xf32, #tpu.memory_space<vmem>>, vector<1x1xf32>
      %c0_96 = arith.constant 0 : index
      %c0_97 = arith.constant 0 : index
      %266 = vector.load %arg5[%c0_96, %c0_97] : memref<1x1xf32, #tpu.memory_space<vmem>>, vector<1x1xf32>
      %267 = arith.addf %265, %266 : vector<1x1xf32>
      %c0_98 = arith.constant 0 : index
      %c0_99 = arith.constant 0 : index
      %268 = vector.load %arg6[%c0_98, %c0_99] : memref<1x1xf32, #tpu.memory_space<vmem>>, vector<1x1xf32>
      tpu.vector_store %arg6[%c0_98, %c0_99], %267 {strides = array<i32>} : memref<1x1xf32, #tpu.memory_space<vmem>>, vector<1x1xf32>,
    } else {
    }
    return
  }
  func.func @transform_0(%arg0: i32, %arg1: i32) -> i32 {
    %c0_i32 = arith.constant 0 : i32
    %c0_i32_0 = arith.constant 0 : i32
    return %c0_i32 : i32
  }
  func.func @transform_1(%arg0: i32, %arg1: i32) -> (i32, i32) {
    %c0_i32 = arith.constant 0 : i32
    %c0_i32_0 = arith.constant 0 : i32
    %c0_i32_1 = arith.constant 0 : i32
    return %c0_i32, %c0_i32_0 : i32, i32
  }
  func.func @transform_2(%arg0: i32, %arg1: i32) -> (i32, i32) {
    %c0_i32 = arith.constant 0 : i32
    return %arg1, %arg0 : i32, i32
  }
  func.func @transform_3(%arg0: i32, %arg1: i32) -> (i32, i32) {
    %c0_i32 = arith.constant 0 : i32
    %c0_i32_0 = arith.constant 0 : i32
    return %c0_i32, %arg0 : i32, i32
  }
  func.func @transform_4(%arg0: i32, %arg1: i32) -> (i32, i32) {
    %c0_i32 = arith.constant 0 : i32
    %c0_i32_0 = arith.constant 0 : i32
    return %c0_i32, %arg0 : i32, i32
  }
}

</mosaic_0001>

<bundles_post_ra>
// kernel: tpu_custom_call.1
= control target key start
LH: loop header
LB: loop body
LE: loop exit
PB: predicated region body
PF: predicated region fallthrough
CT: control target
= control target key end

     0   :  { %s1569_s0 = inlined_call_operand.vmem [shape: f32[32], index: 0, kind: input, shape index: {}]   ;;  %s1570_s1 = inlined_call_operand.vmem [shape: f32[1,128], index: 1, kind: input, shape index: {}]   ;;  %s1571_s2 = inlined_call_operand.vmem [shape: bf16[1024,1], index: 2, kind: input, shape index: {}]   ;;  %s1572_s3 = inlined_call_operand.<no memory space> [shape: f32[1,1], index: 3, kind: input, shape index: {}]   ;;  %s1573_s4 = inlined_call_operand.hbm [shape: f32[1,1], index: 4, kind: output, shape index: {}]  }
   0x1   :  { %v9_v0 = vstv %s1572_s3 }
   0x2   :  { %10 = vst [vmem:[#allocation3] sm:$0x1] %v9_v0 }
   0x3   :  { %11 = vsyncpa [#allocation6], 0 }
   0x4   :  { %12 = vsyncpa [#allocation5], 0  ;;  %s19_s19 = sshll.u32 %s1569_s0, 4  ;;  %s20_s19 = int_to_ptr.vmem [resolvable:$true] %s19_s19 }
   0x5   :  { %s1169_s20 = scalar_lea.vmem %s20_s19, 16  ;;  %p1174_p1 = scmp.lt.s32.totalorder %s20_s19, %s20_s19 }
   0x6   :  { %p1170_p0 = scmp.ne.s32.totalorder %s20_s19, %s1169_s20  ;;  %p1175_p2 = scmp.lt.s32.totalorder %s1169_s20, %s1169_s20 }
   0x8   :  { %p1176_p3 = por %p1175_p2, %p1174_p1 }
   0xa   :  { %p1177_p4 = pnand %p1176_p3, %p1170_p0 }
   0xc   :  { %1180 = shalt.err (!%p1177_p4)
}
   0xd   :  { %s1205_s21 = smov [#allocation4]  }
   0xe   :  { %22 = dma.vmem_to_smem %s20_s19, 16, %s1205_s21, [#allocation6]  }
   0xf   :  { %1201 = dma.done.wait [#allocation6], 16  }
  0x10   :  { %1202 = vsyncadd [#allocation6], 4294967280 }
  0x11   :  { %32 = sfence }
  0x12   :  { %v1244_v1 = vld [vmem:[%s1570_s1] sm:$0x1]  ;;  %s1206_s23 = smov 1   ;;  %v1105_v2 = vld [vmem:[%s1571_s2 + $0x78] sm:$0xff]   ;;  %s1207_s30 = smov 127   ;;  %v1109_v6 = vld [vmem:[%s1571_s2 + $0x70] sm:$0xff]   ;;  %v41_v36 = vlaneseq }
  0x13   :  { %44 = vrot.lane.b32.xlu0 %v1244_v1, %s1206_s23  ;;  %v1106_v3 = vld [vmem:[%s1571_s2 + $0xf8] sm:$0xff]   ;;  %1012 = vmatprep.subr.bf16.mxu0 %v1105_v2  ;;  %v1110_v7 = vld [vmem:[%s1571_s2 + $0xf0] sm:$0xff]   ;;  %v1113_v10 = vld [vmem:[%s1571_s2 + $0x68] sm:$0xff]   ;;  %s1350_s7 = sld [smem:[#allocation4 + $0x4]]  ;;  %vm38_vm2 = vcmask 0  }
  0x14   :  { %v1107_v4 = vld [vmem:[%s1571_s2 + $0x38] sm:$0xff]   ;;  %1034 = vmatprep.subr.bf16.mxu1 %v1106_v3  ;;  %v1111_v8 = vld [vmem:[%s1571_s2 + $0x30] sm:$0xff]   ;;  %v1114_v11 = vld [vmem:[%s1571_s2 + $0xe8] sm:$0xff]   ;;  %s921_s8 = sld [smem:[#allocation4 + $0x5]]  ;;  %v42_v37 = vand.u32 127, %v41_v36 }
  0x15   :  { %v1108_v5 = vld [vmem:[%s1571_s2 + $0xb8] sm:$0xff]   ;;  %1013 = vmatpush3.bf16.msra.mxu0 %v1107_v4  ;;  %v1112_v9 = vld [vmem:[%s1571_s2 + $0xb0] sm:$0xff]   ;;  %v1115_v12 = vld [vmem:[%s1571_s2 + $0x28] sm:$0xff]   ;;  %s1352_s9 = sld [smem:[#allocation4 + $0x6]] }
  0x16   :  { %1035 = vmatpush3.bf16.msra.mxu1 %v1108_v5  ;;  %1014 = vmatprep.subr.bf16.mxu0 %v1109_v6  ;;  %v1116_v13 = vld [vmem:[%s1571_s2 + $0xa8] sm:$0xff]   ;;  %v1117_v14 = vld [vmem:[%s1571_s2 + $0x60] sm:$0xff]   ;;  %v1121_v18 = vld [vmem:[%s1571_s2 + $0x58] sm:$0xff]   ;;  %s1354_s10 = sld [smem:[#allocation4 + $0x7]]  ;;  %vm43_vm0 = vcmp.ge.s32.totalorder %v42_v37, 1  ;;  %vm47_vm1 = vcmp.le.s32.totalorder %v42_v37, 126 }
  0x17   :  { %48 = vrot.lane.b32.xlu0 %v1244_v1, %s1207_s30  ;;  %1036 = vmatprep.subr.bf16.mxu1 %v1110_v7  ;;  %v1118_v15 = vld [vmem:[%s1571_s2 + $0xe0] sm:$0xff]   ;;  %v1122_v19 = vld [vmem:[%s1571_s2 + $0xd8] sm:$0xff]   ;;  %v1125_v22 = vld [vmem:[%s1571_s2 + $0x50] sm:$0xff]   ;;  %s1356_s11 = sld [smem:[#allocation4 + $0xc]] }
  0x18   :  { %v1119_v16 = vld [vmem:[%s1571_s2 + $0x20] sm:$0xff]   ;;  %v1123_v20 = vld [vmem:[%s1571_s2 + $0x18] sm:$0xff]   ;;  %v1126_v23 = vld [vmem:[%s1571_s2 + $0xd0] sm:$0xff]   ;;  %s1358_s12 = sld [smem:[#allocation4 + $0xd]] }
  0x19   :  { %1015 = vmatpush3.bf16.msra.mxu0 %v1111_v8  ;;  %v1120_v17 = vld [vmem:[%s1571_s2 + $0xa0] sm:$0xff]   ;;  %v1124_v21 = vld [vmem:[%s1571_s2 + $0x98] sm:$0xff]   ;;  %v1127_v24 = vld [vmem:[%s1571_s2 + $0x10] sm:$0xff]   ;;  %s1360_s13 = sld [smem:[#allocation4 + $0xe]]  ;;  %v80_v40 = vstv %s1350_s7 }
  0x1a   :  { %1037 = vmatpush3.bf16.msra.mxu1 %v1112_v9  ;;  %1016 = vmatprep.subr.bf16.mxu0 %v1113_v10  ;;  %v1128_v25 = vld [vmem:[%s1571_s2 + $0x90] sm:$0xff]   ;;  %v1129_v26 = vld [vmem:[%s1571_s2 + $0x48] sm:$0xff]   ;;  %v1133_v30 = vld [vmem:[%s1571_s2 + $0x40] sm:$0xff]   ;;  %s1362_s14 = sld [smem:[#allocation4 + $0xf]]  ;;  %v82_v38 = vstv %s921_s8 }
  0x1b   :  { %1038 = vmatprep.subr.bf16.mxu1 %v1114_v11  ;;  %v1130_v27 = vld [vmem:[%s1571_s2 + $0xc8] sm:$0xff]   ;;  %v1134_v31 = vld [vmem:[%s1571_s2 + $0xc0] sm:$0xff]   ;;  %v1137_v34 = vld [vmem:[%s1571_s2 + $0x178] sm:$0xff]   ;;  %s1364_s15 = sld [smem:[#allocation4]]  ;;  %v83_v41 = vmul.f32 %v82_v38, %v1244_v1  ;;  %v85_v42 = vstv %s1352_s9 }
  0x1c   :  { %v1131_v28 = vld [vmem:[%s1571_s2 + $0x8] sm:$0xff]   ;;  %v1135_v32 = vld [vmem:[%s1571_s2] sm:$0xff]   ;;  %v1138_v35 = vld [vmem:[%s1571_s2 + $0x1f8] sm:$0xff]   ;;  %s1366_s16 = sld [smem:[#allocation4 + $0x1]]  ;;  %v88_v44 = vstv %s1354_s10 }
  0x1d   :  { %1017 = vmatpush3.bf16.msra.mxu0 %v1115_v12  ;;  %v1132_v29 = vld [vmem:[%s1571_s2 + $0x88] sm:$0xff]   ;;  %v1136_v33 = vld [vmem:[%s1571_s2 + $0x80] sm:$0xff]   ;;  %s1368_s17 = sld [smem:[#allocation4 + $0x2]]  ;;  %v120_v45 = vstv %s1356_s11 }
  0x1e   :  { %1039 = vmatpush3.bf16.msra.mxu1 %v1116_v13  ;;  %1018 = vmatprep.subr.bf16.mxu0 %v1117_v14  ;;  %s1370_s18 = sld [smem:[#allocation4 + $0x3]]  ;;  %v122_v39 = vstv %s1358_s12 }
  0x1f   :  { %1040 = vmatprep.subr.bf16.mxu1 %v1118_v15  ;;  %s1372_s19 = sld [smem:[#allocation4 + $0x8]]  ;;  %v123_v46 = vmul.f32 %v122_v39, %v1244_v1  ;;  %v125_v48 = vstv %s1360_s13 }
  0x20   :  { %s1374_s20 = sld [smem:[#allocation4 + $0x9]]  ;;  %v128_v49 = vstv %s1362_s14 }
  0x21   :  { %1019 = vmatpush3.bf16.msra.mxu0 %v1119_v16  ;;  %s1376_s21 = sld [smem:[#allocation4 + $0xa]]  ;;  %v59_v50 = vstv %s1364_s15 }
  0x22   :  { %1041 = vmatpush3.bf16.msra.mxu1 %v1120_v17  ;;  %1020 = vmatprep.subr.bf16.mxu0 %v1121_v18  ;;  %s1378_s3 = sld [smem:[#allocation4 + $0xb]]  ;;  %v61_v43 = vstv %s1366_s16 }
  0x23   :  { %1042 = vmatprep.subr.bf16.mxu1 %v1122_v19  ;;  %s1380_s22 = sld [smem:[#allocation4 + $0x14]]  ;;  %v62_v52 = vmul.f32 %v61_v43, %v1244_v1  ;;  %v64_v53 = vstv %s1368_s17 }
  0x24   :  { %s1382_s23 = sld [smem:[#allocation4 + $0x15]]  ;;  %v67_v54 = vstv %s1370_s18 }
  0x25   :  { %1021 = vmatpush3.bf16.msra.mxu0 %v1123_v20  ;;  %s1384_s0 = sld [smem:[#allocation4 + $0x1c]]  ;;  %v100_v55 = vstv %s1372_s19 }
  0x26   :  { %1043 = vmatpush3.bf16.msra.mxu1 %v1124_v21  ;;  %1022 = vmatprep.subr.bf16.mxu0 %v1125_v22  ;;  %s1386_s24 = sld [smem:[#allocation4 + $0x1d]]  ;;  %v102_v47 = vstv %s1374_s20 }
  0x27   :  { %1044 = vmatprep.subr.bf16.mxu1 %v1126_v23  ;;  %s1388_s25 = sld [smem:[#allocation4 + $0x16]]  ;;  %v103_v57 = vmul.f32 %v102_v47, %v1244_v1  ;;  %v105_v62 = vstv %s1376_s21 }
  0x28   :  { %s1391_s26 = sld [smem:[#allocation4 + $0x17]]  ;;  %v108_v63 = vstv %s1378_s3 }
  0x29   :  { %1023 = vmatpush3.bf16.msra.mxu0 %v1127_v24  ;;  %s1393_s27 = sld [smem:[#allocation4 + $0x1e]]  ;;  %v160_v58 = vstv %s1380_s22 }
  0x2a   :  { %1045 = vmatpush3.bf16.msra.mxu1 %v1128_v25  ;;  %1024 = vmatprep.subr.bf16.mxu0 %v1129_v26  ;;  %s1399_s28 = sld [smem:[#allocation4 + $0x1f]]  ;;  %v162_v51 = vstv %s1382_s23 }
  0x2b   :  { %1046 = vmatprep.subr.bf16.mxu1 %v1130_v27  ;;  %v200_v59 = vstv %s1384_s0  ;;  %v163_v0 = vmul.f32 %v162_v51, %v1244_v1  ;;  %v1139_v51 = vld [vmem:[%s1571_s2 + $0x138] sm:$0xff]   ;;  %s1449_s6 = sld [smem:[#allocation4 + $0x10]] }
  0x2c   :  { %v202_v60 = vstv %s1386_s24  ;;  %s1457_s11 = sld [smem:[#allocation4 + $0x11]] }
  0x2d   :  { %1025 = vmatpush3.bf16.msra.mxu0 %v1131_v28  ;;  %v165_v7 = vstv %s1388_s25  ;;  %v203_v9 = vmul.f32 %v202_v60, %v1244_v1  ;;  %s1459_s12 = sld [smem:[#allocation4 + $0x18]]  ;;  %v1148_v60 = vld [vmem:[%s1571_s2 + $0x1a8] sm:$0xff]  }
  0x2e   :  { %1047 = vmatpush3.bf16.msra.mxu1 %v1132_v29  ;;  %1026 = vmatprep.subr.bf16.mxu0 %v1133_v30  ;;  %v168_v12 = vstv %s1391_s26  ;;  %s1467_s17 = sld [smem:[#allocation4 + $0x19]] }
  0x2f   :  { %1048 = vmatprep.subr.bf16.mxu1 %v1134_v31  ;;  %v205_v13 = vstv %s1393_s27  ;;  %s1475_s3 = sld [smem:[#allocation4 + $0x12]] }
  0x30   :  { %v208_v14 = vstv %s1399_s28  ;;  %s1477_s22 = sld [smem:[#allocation4 + $0x1a]] }
  0x31   :  { %1027 = vmatpush3.bf16.msra.mxu0 %v1135_v32  ;;  %s1507_s14 = sld [smem:[#allocation4 + $0x13]] }
  0x32   :  { %1049 = vmatpush3.bf16.msra.mxu1 %v1136_v33  ;;  %1056 = vmatprep.subr.bf16.mxu0 %v1137_v34  ;;  %s1510_s15 = sld [smem:[#allocation4 + $0x1b]] }
  0x33   :  { %1078 = vmatprep.subr.bf16.mxu1 %v1138_v35 }
  0x85   :  { %v45_v56 = vpop.permute.xlu0 %44 }
  0x86   :  { %v1418_v61 = vsel %vm43_vm0, %v45_v56, 0.0  ;;  %v1144_v56 = vld [vmem:[%s1571_s2 + $0x1b0] sm:$0xff]  }
  0x87   :  { %v81_v2 = vmul.f32 %v80_v40, %v1418_v61  ;;  %v121_v3 = vmul.f32 %v120_v45, %v1418_v61  ;;  %v60_v4 = vmul.f32 %v59_v50, %v1418_v61  ;;  %v101_v5 = vmul.f32 %v100_v55, %v1418_v61  ;;  %v1143_v55 = vld [vmem:[%s1571_s2 + $0x130] sm:$0xff]  }
  0x88   :  { %v161_v6 = vmul.f32 %v160_v58, %v1418_v61  ;;  %v201_v8 = vmul.f32 %v200_v59, %v1418_v61  ;;  %v1146_v58 = vld [vmem:[%s1571_s2 + $0x1e8] sm:$0xff]  }
  0x89   :  { %v49_v10 = vpop.permute.xlu0 %48  ;;  %v84_v11 = vadd.f32 %v83_v41, %v81_v2  ;;  %v124_v16 = vadd.f32 %v123_v46, %v121_v3  ;;  %v63_v17 = vadd.f32 %v62_v52, %v60_v4  ;;  %v104_v18 = vadd.f32 %v103_v57, %v101_v5  ;;  %v1142_v52 = vld [vmem:[%s1571_s2 + $0x1f0] sm:$0xff]   ;;  %v1145_v57 = vld [vmem:[%s1571_s2 + $0x168] sm:$0xff]   ;;  %v1152_v2 = vld [vmem:[%s1571_s2 + $0x1a0] sm:$0xff]  }
  0x8a   :  { %v1435_v15 = vsel %vm47_vm1, %v49_v10, 0.0  ;;  %v164_v23 = vadd.f32 %v163_v0, %v161_v6  ;;  %v204_v25 = vadd.f32 %v203_v9, %v201_v8  ;;  %v1147_v59 = vld [vmem:[%s1571_s2 + $0x128] sm:$0xff]   ;;  %v1151_v0 = vld [vmem:[%s1571_s2 + $0x120] sm:$0xff]   ;;  %v140_v3 = vstv %s1449_s6  ;;  %v1154_v8 = vld [vmem:[%s1571_s2 + $0x1d8] sm:$0xff]  }
  0x8b   :  { %v86_v19 = vmul.f32 %v85_v42, %v1435_v15  ;;  %v126_v20 = vmul.f32 %v125_v48, %v1435_v15  ;;  %v65_v21 = vmul.f32 %v64_v53, %v1435_v15  ;;  %v106_v22 = vmul.f32 %v105_v62, %v1435_v15  ;;  %v1149_v62 = vld [vmem:[%s1571_s2 + $0x160] sm:$0xff]  }
  0x8c   :  { %v166_v24 = vmul.f32 %v165_v7, %v1435_v15  ;;  %v206_v26 = vmul.f32 %v205_v13, %v1435_v15  ;;  %v142_v4 = vstv %s1457_s11  ;;  %v180_v5 = vstv %s1459_s12  ;;  %v1153_v7 = vld [vmem:[%s1571_s2 + $0x158] sm:$0xff]  }
  0x8d   :  { %v87_v27 = vadd.f32 %v86_v19, %v84_v11  ;;  %v127_v28 = vadd.f32 %v126_v20, %v124_v16  ;;  %v66_v29 = vadd.f32 %v65_v21, %v63_v17  ;;  %v107_v30 = vadd.f32 %v106_v22, %v104_v18  ;;  %v1155_v16 = vld [vmem:[%s1571_s2 + $0x118] sm:$0xff]   ;;  %v1157_v18 = vld [vmem:[%s1571_s2 + $0x150] sm:$0xff]  }
  0x8e   :  { %v167_v31 = vadd.f32 %v166_v24, %v164_v23  ;;  %v207_v32 = vadd.f32 %v206_v26, %v204_v25  ;;  %v182_v6 = vstv %s1467_s17  ;;  %v145_v9 = vstv %s1475_s3  ;;  %v1156_v17 = vld [vmem:[%s1571_s2 + $0x198] sm:$0xff]   ;;  %v1159_v22 = vld [vmem:[%s1571_s2 + $0x110] sm:$0xff]  }
  0x8f   :  { %v89_v33 = vadd.f32 %v88_v44, %v87_v27  ;;  %v129_v34 = vadd.f32 %v128_v49, %v127_v28  ;;  %v68_v35 = vadd.f32 %v67_v54, %v66_v29  ;;  %v109_v36 = vadd.f32 %v108_v63, %v107_v30  ;;  %v1140_v44 = vld [vmem:[%s1571_s2 + $0x1b8] sm:$0xff]   ;;  %v1141_v49 = vld [vmem:[%s1571_s2 + $0x170] sm:$0xff]   ;;  %v1150_v63 = vld [vmem:[%s1571_s2 + $0x1e0] sm:$0xff]  }
  0x90   :  { %v169_v37 = vadd.f32 %v168_v12, %v167_v31  ;;  %v209_v38 = vadd.f32 %v208_v14, %v207_v32  ;;  %v185_v10 = vstv %s1477_s22  ;;  %v141_v11 = vmul.f32 %v140_v3, %v1418_v61  ;;  %v1160_v23 = vld [vmem:[%s1571_s2 + $0x190] sm:$0xff]   ;;  %v1161_v24 = vld [vmem:[%s1571_s2 + $0x148] sm:$0xff]   ;;  %v1165_v31 = vld [vmem:[%s1571_s2 + $0x140] sm:$0xff]  }
  0x91   :  { %v90_v39 = vmax.f32 %v89_v33, 0.0  ;;  %v130_v40 = vmax.f32 %v129_v34, 0.0  ;;  %v69_v41 = vmax.f32 %v68_v35, 0.0  ;;  %v110_v42 = vmax.f32 %v109_v36, 0.0  ;;  %v1163_v29 = vld [vmem:[%s1571_s2 + $0x108] sm:$0xff]   ;;  %v1166_v32 = vld [vmem:[%s1571_s2 + $0x1c0] sm:$0xff]  }
  0x92   :  { %v170_v43 = vmax.f32 %v169_v37, 0.0  ;;  %v210_v45 = vmax.f32 %v209_v38, 0.0  ;;  %v143_v12 = vmul.f32 %v142_v4, %v1244_v1  ;;  %v181_v13 = vmul.f32 %v180_v5, %v1418_v61  ;;  %v1164_v30 = vld [vmem:[%s1571_s2 + $0x188] sm:$0xff]   ;;  %v1167_v35 = vld [vmem:[%s1571_s2 + $0x100] sm:$0xff]  }
  0x93   :  { %v213_v46 = vpack.c.bf16 %v90_v39, %v90_v39  ;;  %v215_v47 = vpack.c.bf16 %v130_v40, %v130_v40  ;;  %v212_v48 = vpack.c.bf16 %v69_v41, %v69_v41  ;;  %v214_v50 = vpack.c.bf16 %v110_v42, %v110_v42  ;;  %v1168_v36 = vld [vmem:[%s1571_s2 + $0x180] sm:$0xff]  }
  0x94   :  { %v217_v53 = vpack.c.bf16 %v170_v43, %v170_v43  ;;  %v219_v54 = vpack.c.bf16 %v210_v45, %v210_v45  ;;  %v183_v14 = vmul.f32 %v182_v6, %v1244_v1  ;;  %v1158_v1 = vld [vmem:[%s1571_s2 + $0x1d0] sm:$0xff]   ;;  %v146_v61 = vmul.f32 %v145_v9, %v1435_v15  ;;  %v899_v5 = vld [vmem:[#allocation3] sm:$0x1] }
  0x95   :  { %764 = vmatprep.mubr.bf16.mxu0 %v213_v46  ;;  %804 = vmatprep.mubr.bf16.mxu1 %v215_v47  ;;  %v186_v19 = vmul.f32 %v185_v10, %v1435_v15  ;;  %v144_v20 = vadd.f32 %v143_v12, %v141_v11  ;;  %v1162_v15 = vld [vmem:[%s1571_s2 + $0x1c8] sm:$0xff]   ;;  %v148_v27 = vstv %s1507_s14  ;;  %v188_v28 = vstv %s1510_s15  ;;  %s1209_s2 = smov [#allocation7]  }
  0x96   :  { %765 = vmatmul.mubr.bf16.vlgmr.msra.gmra.mxu0 %v212_v48  ;;  %805 = vmatmul.mubr.bf16.vlgmr.msra.gmra.mxu1 %v214_v50  ;;  %v184_v21 = vadd.f32 %v183_v14, %v181_v13  ;;  %v1208_v41 = vmov 0.0   ;;  %s908_s15 = sshll.u32 %s1209_s2, 4  ;;  %s909_s15 = int_to_ptr.vmem [resolvable:$true] %s908_s15 }
  0x97   :  { %1057 = vmatpush3.bf16.msra.mxu0 %v1139_v51  ;;  %1079 = vmatpush3.bf16.msra.mxu1 %v1140_v44  ;;  %v147_v25 = vadd.f32 %v146_v61, %v144_v20  ;;  %39 = vst.msk [vmem:[#allocation2] sm:$0x1] %vm38_vm2, %v1208_v41  ;;  %s1181_s6 = scalar_lea.vmem %s909_s15, 16  ;;  %s1185_s11 = scalar_lea.vmem %s909_s15, 32 }
  0x98   :  { %844 = vmatprep.mubr.bf16.mxu0 %v217_v53  ;;  %884 = vmatprep.mubr.bf16.mxu1 %v219_v54  ;;  %v187_v26 = vadd.f32 %v186_v19, %v184_v21  ;;  %p1182_p5 = scmp.ne.s32.totalorder %s909_s15, %s1181_s6  ;;  %p1186_p6 = scmp.lt.s32.totalorder %s909_s15, %s909_s15 }
  0x99   :  { %1058 = vmatprep.subr.bf16.mxu0 %v1141_v49  ;;  %1080 = vmatprep.subr.bf16.mxu1 %v1142_v52  ;;  %v149_v33 = vadd.f32 %v148_v27, %v147_v25  ;;  %p1187_p7 = scmp.lt.s32.totalorder %s1185_s11, %s1181_s6 }
  0x9a   :  { %v189_v34 = vadd.f32 %v188_v28, %v187_v26 }
  0x9b   :  { %1059 = vmatpush3.bf16.msra.mxu0 %v1143_v55  ;;  %1081 = vmatpush3.bf16.msra.mxu1 %v1144_v56  ;;  %v150_v37 = vmax.f32 %v149_v33, 0.0  ;;  %p1188_p8 = por %p1187_p7, %p1186_p6 }
  0x9c   :  { %1060 = vmatprep.subr.bf16.mxu0 %v1145_v57  ;;  %1082 = vmatprep.subr.bf16.mxu1 %v1146_v58  ;;  %v190_v38 = vmax.f32 %v189_v34, 0.0 }
  0x9d   :  { %v216_v39 = vpack.c.bf16 %v150_v37, %v150_v37  ;;  %p1189_p9 = pnand %p1188_p8, %p1182_p5 }
  0x9e   :  { %v218_v40 = vpack.c.bf16 %v190_v38, %v190_v38 }
  0x9f   :  { %1061 = vmatpush3.bf16.msra.mxu0 %v1147_v59  ;;  %1083 = vmatpush3.bf16.msra.mxu1 %v1148_v60 }
  0xa0   :  { %1062 = vmatprep.subr.bf16.mxu0 %v1149_v62  ;;  %1084 = vmatprep.subr.bf16.mxu1 %v1150_v63 }
  0xa3   :  { %1063 = vmatpush3.bf16.msra.mxu0 %v1151_v0  ;;  %1085 = vmatpush3.bf16.msra.mxu1 %v1152_v2  ;;  %v211_v2 = vld [vmem:[#allocation2] sm:$0x1] }
  0xa4   :  { %1064 = vmatprep.subr.bf16.mxu0 %v1153_v7  ;;  %1086 = vmatprep.subr.bf16.mxu1 %v1154_v8 }
  0xa7   :  { %1065 = vmatpush3.bf16.msra.mxu0 %v1155_v16  ;;  %1087 = vmatpush3.bf16.msra.mxu1 %v1156_v17 }
  0xa8   :  { %1066 = vmatprep.subr.bf16.mxu0 %v1157_v18  ;;  %1088 = vmatprep.subr.bf16.mxu1 %v1158_v1 }
  0xab   :  { %1067 = vmatpush3.bf16.msra.mxu0 %v1159_v22  ;;  %1089 = vmatpush3.bf16.msra.mxu1 %v1160_v23 }
  0xac   :  { %1068 = vmatprep.subr.bf16.mxu0 %v1161_v24  ;;  %1090 = vmatprep.subr.bf16.mxu1 %v1162_v15 }
  0xaf   :  { %1069 = vmatpush3.bf16.msra.mxu0 %v1163_v29  ;;  %1091 = vmatpush3.bf16.msra.mxu1 %v1164_v30 }
  0xb0   :  { %1070 = vmatprep.subr.bf16.mxu0 %v1165_v31  ;;  %1092 = vmatprep.subr.bf16.mxu1 %v1166_v32 }
  0xb3   :  { %1071 = vmatpush3.bf16.msra.mxu0 %v1167_v35  ;;  %1093 = vmatpush3.bf16.msra.mxu1 %v1168_v36 }
  0xb6   :  { %845 = vmatmul.mubr.bf16.vlgmr.msra.gmra.mxu0 %v216_v39  ;;  %885 = vmatmul.mubr.bf16.vlgmr.msra.gmra.mxu1 %v218_v40 }
 0x156   :  { %v1028_v42 = vpop.f32.mrf.mxu0  ;;  %v1050_v43 = vpop.f32.mrf.mxu1 }
 0x158   :  { %v1029_v45 = vpop.f32.mrf.mxu0  ;;  %v1051_v46 = vpop.f32.mrf.mxu1 }
 0x159   :  { %v1030_v44 = vadd.f32 %v1029_v45, %v1028_v42  ;;  %v1052_v49 = vadd.f32 %v1051_v46, %v1050_v43 }
 0x15a   :  { %v1031_v47 = vpop.f32.mrf.mxu0  ;;  %v1053_v48 = vpop.f32.mrf.mxu1 }
 0x15b   :  { %v807_v56 = vadd.f32 %v1052_v49, %v1030_v44 }
 0x15c   :  { %v1032_v50 = vpop.f32.mrf.mxu0  ;;  %v1054_v51 = vpop.f32.mrf.mxu1 }
 0x176   :  { %v1072_v52 = vpop.f32.mrf.mxu0  ;;  %v1094_v53 = vpop.f32.mrf.mxu1 }
 0x178   :  { %v1073_v54 = vpop.f32.mrf.mxu0  ;;  %v1095_v55 = vpop.f32.mrf.mxu1 }
 0x179   :  { %v1074_v57 = vadd.f32 %v1073_v54, %v1072_v52  ;;  %v1096_v62 = vadd.f32 %v1095_v55, %v1094_v53 }
 0x17a   :  { %v1075_v58 = vpop.f32.mrf.mxu0  ;;  %v1097_v59 = vpop.f32.mrf.mxu1 }
 0x17b   :  { %v847_v60 = vadd.f32 %v1074_v57, %v807_v56 }
 0x17c   :  { %v1076_v63 = vpop.f32.mrf.mxu0  ;;  %v1098_v0 = vpop.f32.mrf.mxu1 }
 0x17d   :  { %v887_v3 = vadd.f32 %v1096_v62, %v847_v60 }
 0x17f   :  { %v892_v4 = vadd.f32 %v887_v3, %v211_v2 }
 0x181   :  { %894 = vst.msk [vmem:[#allocation2] sm:$0x1] %vm38_vm2, %v892_v4 }
 0x188   :  { %v898_v6 = vld [vmem:[#allocation2] sm:$0x1] }
 0x189   :  { %v900_v7 = vadd.f32 %v899_v5, %v898_v6 }
 0x18b   :  { %901 = vst.msk [vmem:[#allocation7] sm:$0x1] %vm38_vm2, %v900_v7 }
 0x18c   :  { %1192 = shalt.err (!%p1189_p9)
}
 0x18d   :  { %911 = dma.vmem_to_hbm [thread:$0]  %s909_s15, 16, %s1573_s4, [#allocation5]  }
 0x18e   :  { %1203 = dma.done.wait [#allocation5], 16  }
 0x18f   :  { %1204 = vsyncadd [#allocation5], 4294967280 }
 0x190   :  { %915 = vsyncpa [#allocation5], 1 }
 0x191   :  { %916 = vsyncpa [#allocation6], 1 }

</bundles_post_ra>
